<compile_context>
chip_gen: v6e
topology: v6e:2x2x1
jax: 0.10.0
libtpu: 0.0.40
codegen_flags: <defaults>
</compile_context>

<pallas_src>
import functools

import jax
import jax.numpy as jnp
from jax.experimental import pallas as pl
from jax.experimental.pallas import tpu as pltpu


_CHUNK_C = 64            # channel-chunk size for the large-C reduction path
_CHUNK_THRESHOLD = 256   # switch to the chunked path when C >= this


def _round_up(x, m):
    return (x + m - 1) // m * m


def _vmem_policy():
    """Per-generation (vmem_budget_bytes, vmem_limit_bytes)."""
    mib = 1024 * 1024
    cap = None
    try:
        info = pltpu.get_tpu_info()
        for name in ("vmem_capacity_bytes", "vmem_size_bytes", "vmem_bytes"):
            cap = getattr(info, name, None)
            if cap:
                break
    except Exception:
        cap = None
    if not cap:
        # Unknown hardware: stay under the smallest default scoped limit
        # (16 MiB on v5e) and keep Mosaic's default vmem limit.
        return 12 * mib, None
    if cap <= 80 * mib:
        # v7x-class: 64 MiB VMEM per TensorCore.
        return 24 * mib, 28 * mib
    # v5e / v6e: 128 MiB physical VMEM.
    return 40 * mib, 48 * mib


def _choose_tiles(N, C, S, in_itemsize, out_itemsize, buffer_count, chunk_c,
                  vmem_budget_bytes, max_ts=32768,
                  target_in_block=3 * 1024 * 1024):
    """Pick (NB, TS): batch rows per step and lane-tile width."""
    in_sub = 16 if in_itemsize == 2 else 8
    out_sub = 16 if out_itemsize == 2 else 8
    c_in_pad = _round_up(C, in_sub)                      # sublane-padded x tile
    c_inter = _round_up(C if chunk_c is None else min(C, chunk_c), 8)

    def blk_bytes(nb, ts):
        nb_out = _round_up(nb, out_sub)
        in_blk = nb * c_in_pad * ts * in_itemsize
        out_blk = nb_out * ts * out_itemsize
        inter = nb * c_inter * ts * 4 + nb_out * ts * 4  # f32 exp chunk + f32 sum
        return buffer_count * (in_blk + out_blk) + inter

    def steps(nb, ts):
        return pl.cdiv(N, nb) * pl.cdiv(S, ts)

    # Output second-to-last block dim must be a sublane-tile multiple or equal
    # to N (either way: full-tile unmasked stores).
    nb = N if N < out_sub else out_sub

    # Lane tile: multiple of 128 (or the full dim when S < 128).
    if S < 128:
        lane_cap = S
    elif S % 128 == 0:
        lane_cap = min(S, max_ts)
    else:
        lane_cap = min((S // 128) * 128, max_ts)

    ts = lane_cap
    while ts > 128 and blk_bytes(nb, ts) > vmem_budget_bytes:
        ts = max(128, ((ts // 2) // 128) * 128)

    # Lane axis exhausted but the block is still small -> grow the batch rows.
    while (ts >= lane_cap and nb + out_sub <= N
           and nb * c_in_pad * ts * in_itemsize < target_in_block
           and blk_bytes(nb + out_sub, ts) <= vmem_budget_bytes):
        nb += out_sub

    # Megacore: keep at least 2 grid steps whenever the data allows (a
    # single-block grid leaves the second v7x TensorCore idle).
    while steps(nb, ts) < 2 and ts > 128:
        ts = max(128, ((ts // 2) // 128) * 128)
    while steps(nb, ts) < 2 and nb > out_sub:
        nb -= out_sub

    return nb, ts


def _clust_min_pool_kernel(x_ref, o_ref, *, beta, eps, bf16_exp, chunk):
    # x_ref: (NB, C, TS) VMEM tile; o_ref: (NB, TS) VMEM tile.
    nb, c, ts = x_ref.shape

    def exp_sum(xb):
        # Scale in f32 (keeps precision on the bf16-exp path too), exponentiate,
        # and accumulate over channels in f32.
        xf = xb.astype(jnp.float32) * (-beta)
        if bf16_exp:
            e = jnp.exp(xf.astype(jnp.bfloat16)).astype(jnp.float32)
        else:
            e = jnp.exp(xf)
        return jnp.sum(e, axis=1)

    if chunk is None or chunk >= c:
        s = exp_sum(x_ref[...])
    else:
        # Large-C path: chunked reduction keeps the f32 exp intermediate small.
        n_full = c // chunk

        def body(ci, acc):
            c0 = pl.multiple_of(ci * chunk, chunk)
            return acc + exp_sum(x_ref[:, pl.ds(c0, chunk), :])

        s = jax.lax.fori_loop(0, n_full, body,
                              jnp.zeros((nb, ts), jnp.float32))
        if c % chunk:
            s = s + exp_sum(x_ref[:, n_full * chunk:, :])

    o_ref[...] = (-jnp.log(s + eps)).astype(o_ref.dtype)


def clust_min_pool(x, beta, eps=1e-10, *, bf16_exp=False, buffer_count=2,
                   vmem_budget_bytes=None, vmem_limit_bytes=None):
    """ClustMinPoolLayer forward: x (N, C, H, W) -> (N, H, W) in x.dtype.

    bf16 inputs are accepted as-is (halving HBM read bytes; the big win on
    v6e/v7x) -- math is upcast to f32 in-kernel.  `bf16_exp=True` is a
    v6e/v7x-only micro-knob; never enable it on v5e (no bf16 VPU/EUP).
    """
    N, C, H, W = x.shape
    S = H * W
    in_itemsize = jnp.dtype(x.dtype).itemsize
    out_dtype = x.dtype
    out_itemsize = jnp.dtype(out_dtype).itemsize

    auto_budget, auto_limit = _vmem_policy()
    if vmem_budget_bytes is None:
        vmem_budget_bytes = auto_budget
    if vmem_limit_bytes is None:
        vmem_limit_bytes = auto_limit

    chunk_c = _CHUNK_C if C >= _CHUNK_THRESHOLD else None
    NB, TS = _choose_tiles(N, C, S, in_itemsize, out_itemsize, buffer_count,
                           chunk_c, vmem_budget_bytes)

    kernel = functools.partial(
        _clust_min_pool_kernel, beta=float(beta), eps=float(eps),
        bf16_exp=bf16_exp, chunk=chunk_c)
    # TODO(synk): if beta/eps ever vary at runtime, feed them via an SMEM scalar
    # instead of functools.partial to avoid a recompile per value.

    in_spec_kwargs = {}
    if buffer_count != 2:  # default double-buffering unless overridden
        in_spec_kwargs["pipeline_mode"] = pl.Buffered(buffer_count)

    compiler_kwargs = dict(dimension_semantics=("parallel", "parallel"))
    if vmem_limit_bytes is not None:
        compiler_kwargs["vmem_limit_bytes"] = int(vmem_limit_bytes)

    x_flat = x.reshape(N, C, S)  # contiguous reshape: no HBM copy

    out_flat = pl.pallas_call(
        kernel,
        out_shape=jax.ShapeDtypeStruct((N, S), out_dtype),
        grid_spec=pltpu.PrefetchScalarGridSpec(
            num_scalar_prefetch=0,
            grid=(pl.cdiv(N, NB), pl.cdiv(S, TS)),
            in_specs=[pl.BlockSpec((NB, C, TS), lambda i, j: (i, 0, j),
                                   **in_spec_kwargs)],
            out_specs=pl.BlockSpec((NB, TS), lambda i, j: (i, j)),
        ),
        compiler_params=pltpu.CompilerParams(**compiler_kwargs),
        cost_estimate=pl.CostEstimate(
            flops=2 * N * C * S,
            transcendentals=N * C * S + N * S,
            bytes_accessed=N * C * S * in_itemsize + N * S * out_itemsize),
    )(x_flat)

    return out_flat.reshape(N, H, W)


if __name__ == "__main__":
    beta = 2.0
    eps = 1e-10

    def ref_fn(x):
        xf = x.astype(jnp.float32)
        return -jnp.log(jnp.sum(jnp.exp(xf * -beta), axis=1) + eps)

    key = jax.random.PRNGKey(0)
    k0, k1, k2 = jax.random.split(key, 3)

    # Primary check: small NCHW input matching the module spec.
    N, C, H, W = 2, 4, 16, 16
    x = jax.random.normal(k0, (N, C, H, W), dtype=jnp.float32)
    out = jax.block_until_ready(clust_min_pool(x, beta, eps))
    assert out.shape == (N, H, W)
    assert jnp.allclose(out, ref_fn(x), atol=1e-5, rtol=1e-5)

    # Boundary blocks on both axes (N=9 with NB=8, S=130 with TS=128) -- no pad.
    x2 = jax.random.normal(k1, (9, 3, 10, 13), dtype=jnp.float32)
    out2 = jax.block_until_ready(clust_min_pool(x2, beta, eps))
    assert out2.shape == (9, 10, 13)
    assert jnp.allclose(out2, ref_fn(x2), atol=1e-5, rtol=1e-5)

    # Large-C chunked-reduction path (C=320 -> 5 x 64-channel chunks).
    x3 = jax.random.normal(k2, (2, 320, 8, 16), dtype=jnp.float32)
    out3 = jax.block_until_ready(clust_min_pool(x3, beta, eps))
    assert out3.shape == (2, 8, 16)
    assert jnp.allclose(out3, ref_fn(x3), atol=1e-4, rtol=1e-5)

    # bf16 inputs (the HBM-bytes lever on v6e/v7x): f32 math, bf16 in/out.
    xb = x.astype(jnp.bfloat16)
    outb = jax.block_until_ready(clust_min_pool(xb, beta, eps))
    assert outb.dtype == jnp.bfloat16
    assert jnp.allclose(outb.astype(jnp.float32), ref_fn(xb),
                        atol=6e-2, rtol=3e-2)

    # bf16-exp micro-knob (v6e/v7x only): looser tolerance vs the f32 reference.
    out4 = jax.block_until_ready(clust_min_pool(x, beta, eps, bf16_exp=True))
    assert jnp.allclose(out4, ref_fn(x), atol=1e-1, rtol=5e-2)

    print("KERNEL_OK")
</pallas_src>

<mosaic_0001>
module attributes {stable_mosaic.version = 11 : i64} {
  func.func @_clust_min_pool_kernel(%arg0: i32, %arg1: i32, %arg2: memref<2x4x128xf32, #tpu.memory_space<vmem>>, %arg3: memref<2x128xf32, #tpu.memory_space<vmem>>) attributes {dimension_semantics = [#tpu.dimension_semantics<parallel>, #tpu.dimension_semantics<parallel>], iteration_bounds = array<i64: 1, 2>, scalar_prefetch = 0 : i64, scratch_operands = 0 : i64, tpu.core_type = #tpu.core_type<tc>, window_params = [{transform_indices = @transform_0, window_bounds = array<i64: 2, 4, 128>}, {transform_indices = @transform_1, window_bounds = array<i64: 2, 128>}]} {
    %c0 = arith.constant 0 : index
    %c0_0 = arith.constant 0 : index
    %c0_1 = arith.constant 0 : index
    %0 = vector.load %arg2[%c0, %c0_0, %c0_1] : memref<2x4x128xf32, #tpu.memory_space<vmem>>, vector<2x4x128xf32>
    %cst = arith.constant -2.000000e+00 : f32
    %1 = vector.broadcast %cst : f32 to vector<2x4x128xf32>
    %2 = arith.mulf %0, %1 : vector<2x4x128xf32>
    %3 = math.exp %2 : vector<2x4x128xf32>
    %cst_2 = arith.constant dense<0.000000e+00> : vector<2x128xf32>
    %4 = vector.multi_reduction <add>, %3, %cst_2 [1] : vector<2x4x128xf32> to vector<2x128xf32>
    %cst_3 = arith.constant 1.000000e-10 : f32
    %5 = vector.broadcast %cst_3 : f32 to vector<2x128xf32>
    %6 = arith.addf %4, %5 : vector<2x128xf32>
    %7 = math.log %6 : vector<2x128xf32>
    %cst_4 = arith.constant 0.000000e+00 : f32
    %8 = vector.broadcast %cst_4 : f32 to vector<2x128xf32>
    %9 = arith.subf %8, %7 : vector<2x128xf32>
    %c0_5 = arith.constant 0 : index
    %c0_6 = arith.constant 0 : index
    %10 = vector.load %arg3[%c0_5, %c0_6] : memref<2x128xf32, #tpu.memory_space<vmem>>, vector<2x128xf32>
    tpu.vector_store %arg3[%c0_5, %c0_6], %9 {strides = array<i32>} : memref<2x128xf32, #tpu.memory_space<vmem>>, vector<2x128xf32>,
    return
  }
  func.func @transform_0(%arg0: i32, %arg1: i32) -> (i32, i32, i32) {
    %c0_i32 = arith.constant 0 : i32
    %c0_i32_0 = arith.constant 0 : i32
    return %arg0, %c0_i32, %arg1 : i32, i32, i32
  }
  func.func @transform_1(%arg0: i32, %arg1: i32) -> (i32, i32) {
    %c0_i32 = arith.constant 0 : i32
    return %arg0, %arg1 : i32, i32
  }
}

</mosaic_0001>

<bundles_post_ra>
// kernel: tpu_custom_call.1
= control target key start
LH: loop header
LB: loop body
LE: loop exit
PB: predicated region body
PF: predicated region fallthrough
CT: control target
= control target key end

     0   :  { %6 = vsyncpa [#allocation3], 0  ;;  %s637_s0 = inlined_call_operand.hbm [shape: f32[2,4,256], index: 0, kind: input, shape index: {}]   ;;  %s638_s1 = inlined_call_operand.hbm [shape: f32[2,256], index: 1, kind: output, shape index: {}]  }
   0x1   :  { %8 = vsyncpa [#allocation3 + $0x1], 0 }
   0x2   :  { %9 = vsyncpa [#allocation4], 0 }
   0x3   :  { %11 = vsyncpa [#allocation4 + $0x1], 0  ;;  %s500_s6 = smov 0   ;;  %s502_s7 = smov 0  }
   0x4   :  { %s504_s8 = smov 0   ;;  %s506_s9 = smov 0  }
   0x5   :  { %s508_s10 = smov 0   ;;  %s510_s11 = smov 0  }
   0x6 LB: > { %s289_s12 = sadd.s32 4294967295, %s483_s11   ;;  %s290_s13 = sadd.s32 4294967294, %s483_s11   ;;  %s483_s11 = sphi %s510_s11, %s17_s11   ;;  %s479_s10 = sphi %s508_s10, %s649_s10   ;;  %s475_s9 = sphi %s506_s9, %s648_s9   ;;  %s471_s8 = sphi %s504_s8, %s647_s8   ;;  %s467_s7 = sphi %s502_s7, %s646_s7   ;;  %s463_s6 = sphi %s500_s6, %s645_s6  }
   0x7   : > { %s26_s14 = sadd.s32 1, %s479_s10  ;;  %s38_s15 = sadd.s32 1, %s471_s8 }
   0x8   : > { %p27_p0 = scmp.ge.s32.totalorder %s26_s14, 2  ;;  %p45_p1 = scmp.ne.s32.totalorder %s471_s8, %s467_s7 }
   0x9   : > { %p46_p2 = scmp.eq.s32.totalorder %s483_s11, 0  ;;  %p51_p3 = scmp.ne.s32.totalorder %s467_s7, %s463_s6 }
   0xa   : > { %s651_s14 = smov (%p27_p0, %s26_s14), 0  ;;  %p52_p5 = scmp.eq.s32.totalorder %s289_s12, 0 }
   0xb   : > { %p541_p4 = por %p46_p2, %p45_p1  ;;  %s34_s17 = ssub.s32 %s479_s10, %s651_s14 }
   0xc   : > { %p77_p6 = scmp.eq.s32.totalorder %s289_s12, 1  ;;  %p36_p7 = scmp.eq.s32.totalorder %s34_s17, 0 }
   0xd   : > { %p547_p8 = por %p52_p5, %p51_p3  ;;  %p83_p10 = scmp.eq.s32.totalorder %s290_s13, 1 }
   0xe   : > { %p551_p9 = por %p77_p6, %p45_p1  ;;  %p314_p13 = scmp.lt.s32.totalorder %s483_s11, 2 }
   0xf   : > { %s556_s20 = scalar_select %p36_p7, %s471_s8, %s38_s15  }
  0x10   : > { %p558_p11 = por %p83_p10, %p51_p3  ;;  %s103_s22 = sand.u32 1, %s471_s8  }
  0x11   : > { %s293_s23 = sshll.u32 %s103_s22, 3  ;;  %s294_s24 = sshll.u32 %s479_s10, 6 }
  0x12   : > { %s115_s27 = scalar_lea.hbm %s637_s0, %s294_s24  ;;  %s107_s28 = scalar_lea.vmem [#allocation2], %s293_s23 }
  0x13   : > { %s116_s29 = sshll.u32 %s107_s28, 4  ;;  %p571_p0 = pnand %p314_p13, %p541_p4  ;;  %s117_s29 = int_to_ptr.vmem [resolvable:$true] %s116_s29 }
  0x14   : > { %s104_s2 = scalar_lea.sflag [#allocation3], %s103_s22  ;;  %s388_s3 = scalar_lea.vmem %s117_s29, 128 }
  0x15   : > { %p377_p1 = pneg %p571_p0  ;;  %p389_p2 = scmp.ne.s32.totalorder %s117_s29, %s388_s3 }
  0x16   : > { %s485_s4 = smov [#allocation2]  }
  0x17   : > { %p391_p3 = pnand %p389_p2, %p377_p1  ;;  %s393_s5 = sshll.u32 %s485_s4, 4  ;;  %s394_s5 = int_to_ptr.vmem [resolvable:$false] %s393_s5 }
  0x18   : > { %s395_s12 = scalar_lea.vmem %s394_s5, 256  ;;  %p396_p6 = scmp.lt.s32.totalorder %s117_s29, %s394_s5 }
  0x19   : > { %p392_p5 = pneg %p391_p3  ;;  %p397_p7 = scmp.lt.s32.totalorder %s395_s12, %s388_s3 }
  0x1b   : > { %p398_p10 = por %p397_p7, %p396_p6 }
  0x1d   : > { %p399_p12 = pnand %p398_p10, %p392_p5 }
  0x1f   : > { %402 = shalt.err (!%p399_p12)
}
  0x20   : > { %s486_s13 = smov 128   ;;  %s487_s15 = smov 64  }
  0x21   : > { %s488_s16 = smov 4   ;;  %p295_p4 = scmp.ge.s32.totalorder %s483_s11, 1 }
  0x22   : > { %309 = dma.hbm_to_vmem [thread:$0]  (!%p571_p0), %s115_s27, 128, %s117_s29, %s104_s2, %s486_s13, %s487_s15, %s488_s16  }
  0x23   : > { %p124_p13 = scmp.lt.s32.totalorder %s483_s11, 3 }
  0x25   : > { %p125_p1 = pnand %p295_p4, %p124_p13 }
  0x26   : > { %s582_s17 = sand.u32 (!%p125_p1), 1, %s467_s7  }
  0x27   : > { %128 = sbr.rel (%p125_p1) target bundleno = 112 (0x70), region = 24  ;;  %s296_s22 = sshll.u32 (!%p125_p1), %s582_s17, 3 }
  0x28   : > { %s131_s23 = scalar_lea.sflag (!%p125_p1), [#allocation3], %s582_s17  ;;  %s134_s24 = scalar_lea.vmem (!%p125_p1), [#allocation2], %s296_s22 }
  0x2c   : > { %454 = dma.done.wait (%p547_p8), %s131_s23, 128  }
  0x2d   : > { %456 = vsyncadd (%p547_p8), %s131_s23, 4294967168  ;;  %v154_v0 = vld [vmem:[%s134_s24] sm:$0xf]  ;;  %v155_v1 = vld [vmem:[%s134_s24 + $0x4] sm:$0xf]  ;;  %vm162_vm0 = vcmask 1043456  }
  0x2e   : > { %v156_v2 = vmul.f32 -2.0, %v154_v0  ;;  %v157_v3 = vmul.f32 -2.0, %v155_v1  ;;  %s297_s18 = sshll.u32 %s582_s17, 1  ;;  %s299_s27 = sshll.u32 %s475_s9, 5  ;;  %vm187_vm1 = vcmask 1041409  }
  0x2f   : > { %s152_s25 = scalar_lea.vmem [#allocation5], %s297_s18  ;;  %s205_s30 = scalar_lea.hbm %s638_s1, %s299_s27 }
  0x30   : > { %v158_v4 = vmul.f32 1.442695, %v156_v2  ;;  %v160_v5 = vmul.f32 1.442695, %v157_v3  ;;  %s207_s26 = sshll.u32 %s152_s25, 4  ;;  %s192_s2 = scalar_lea.sflag [#allocation4], %s582_s17  ;;  %s592_s26 = int_to_ptr.vmem [resolvable:$true] %s207_s26 }
  0x31   : > { %s403_s3 = scalar_lea.vmem %s592_s26, 32  ;;  %s489_s9 = smov [#allocation5]  }
  0x32   : > { %367 = vpow2.f32 %v158_v4  ;;  %p404_p8 = scmp.ne.s32.totalorder %s592_s26, %s403_s3  ;;  %s407_s4 = sshll.u32 %s489_s9, 4  ;;  %s408_s4 = int_to_ptr.vmem [resolvable:$false] %s407_s4 }
  0x33   : > { %369 = vpow2.f32 %v160_v5  ;;  %s409_s5 = scalar_lea.vmem %s408_s4, 64  ;;  %p410_p2 = scmp.lt.s32.totalorder %s592_s26, %s408_s4 }
  0x34   : > { %p405_p12 = pnand %p404_p8, %p551_p9  ;;  %p411_p3 = scmp.lt.s32.totalorder %s409_s5, %s403_s3 }
  0x36   : > { %p406_p0 = pneg %p405_p12  ;;  %p412_p5 = por %p411_p3, %p410_p2 }
  0x38   : > { %p413_p6 = pnand %p412_p5, %p406_p0 }
  0x3f   : > { %v368_v6 = vpop.eup %367 }
  0x40   : > { %v370_v7 = vpop.eup %369  ;;  %v163_v8 = vsel %vm162_vm0, %v368_v6, 0.0 }
  0x41   : > { %v164_v9 = vrot.slane %v163_v8, 4  ;;  %v170_v10 = vsel %vm162_vm0, %v370_v7, 0.0 }
  0x42   : > { %v171_v11 = vrot.slane %v170_v10, 4 }
  0x43   : > { %v165_v12 = vadd.f32 %v164_v9, %v163_v8 }
  0x44   : > { %v172_v13 = vadd.f32 %v171_v11, %v170_v10 }
  0x45   : > { %v166_v14 = vrot.slane %v165_v12, 2 }
  0x46   : > { %v173_v15 = vrot.slane %v172_v13, 2 }
  0x47   : > { %v167_v16 = vadd.f32 %v166_v14, %v165_v12 }
  0x48   : > { %v174_v17 = vadd.f32 %v173_v15, %v172_v13 }
  0x49   : > { %v168_v18 = vrot.slane %v167_v16, 1 }
  0x4a   : > { %v175_v19 = vrot.slane %v174_v17, 1 }
  0x4b   : > { %v169_v20 = vadd.f32 %v168_v18, %v167_v16 }
  0x4c   : > { %v176_v21 = vadd.f32 %v175_v19, %v174_v17 }
  0x4d   : > { %v177_v22 = vadd.f32 1e-10, %v169_v20 }
  0x4e   : > { %v178_v23 = vadd.f32 1e-10, %v176_v21 }
  0x4f   : > { %371 = vlog2.f32 %v177_v22 }
  0x50   : > { %373 = vlog2.f32 %v178_v23 }
  0x5c   : > { %v372_v24 = vpop.eup %371 }
  0x5d   : > { %v374_v25 = vpop.eup %373  ;;  %v180_v26 = vmul.f32 0.6931472, %v372_v24 }
  0x5e   : > { %v182_v27 = vmul.f32 0.6931472, %v374_v25 }
  0x5f   : > { %v183_v28 = vsub.f32 0.0, %v180_v26 }
  0x60   : > { %v184_v29 = vsub.f32 0.0, %v182_v27 }
  0x62   : > { %v188_v30 = vsel %vm187_vm1, %v184_v29, %v183_v28 }
  0x63   : > { %190 = vst [vmem:[%s152_s25] sm:$0x3] %v188_v30 }
  0x64   : > { %416 = shalt.err (!%p413_p6)
}
  0x65   : > { %s417_s12 = scalar_lea.hbm %s205_s30, 32  ;;  %s421_s16 = scalar_lea.hbm %s638_s1, 64 }
  0x66   : > { %p418_p7 = scmp.ne.s32.totalorder %s205_s30, %s417_s12  ;;  %p422_p13 = scmp.lt.s32.totalorder %s205_s30, %s638_s1 }
  0x67   : > { %p423_p1 = scmp.lt.s32.totalorder %s421_s16, %s417_s12 }
  0x68   : > { %p419_p10 = pnand %p418_p7, %p551_p9 }
  0x69   : > { %p424_p8 = por %p423_p1, %p422_p13 }
  0x6a   : > { %p420_p4 = pneg %p419_p10 }
  0x6c   : > { %p425_p12 = pnand %p424_p8, %p420_p4 }
  0x6e   : > { %428 = shalt.err (!%p425_p12)
}
  0x6f   : > { %304 = dma.vmem_to_hbm [thread:$0]  (%p551_p9), %s592_s26, 32, %s205_s30, %s192_s2  }
  0x70 PF: > { %s219_s23 = sand.u32 1, %s463_s6   ;;  %p644_p0 = scmp.ge.s32.totalorder %s483_s11, 2 }
  0x71   : > { %s220_s24 = scalar_lea.sflag [#allocation4], %s219_s23 }
  0x72   : > { %p311_p2 = pnand %p644_p0, %p558_p11 }
  0x74   : > { %p312_p3 = pneg %p311_p2 }
  0x76   : > { %458 = dma.done.wait (%p312_p3), %s220_s24, 32  }
  0x77   : > { %460 = vsyncadd (%p312_p3), %s220_s24, 4294967264  ;;  %s17_s11 = sadd.s32 1, %s483_s11   ;;  %s645_s6 = smov %s467_s7 }
  0x78   : > { %p14_p5 = scmp.ge.s32.totalorder %s17_s11, 4   ;;  %s646_s7 = smov %s471_s8 }
  0x79   : > { %s647_s8 = smov %s556_s20  ;;  %s648_s9 = smov %s479_s10 }
  0x7a   : > { %s649_s10 = smov %s651_s14  ;;  %16 = sbr.rel (!%p14_p5) target bundleno = 6 (0x6), region = 69 }
  0x7f   :  { %225 = vsyncpa [#allocation3], 1 }
  0x80   :  { %227 = vsyncpa [#allocation3 + $0x1], 1 }
  0x81   :  { %228 = vsyncpa [#allocation4], 1 }
  0x82   :  { %230 = vsyncpa [#allocation4 + $0x1], 1 }

</bundles_post_ra>
